<compile_context>
chip_gen: v5e
topology: v5e:2x2
jax: 0.10.0
libtpu: 0.0.40
codegen_flags: <defaults>
</compile_context>

<pallas_src>
import jax
import jax.numpy as jnp
from jax import lax
from jax.experimental import pallas as pl
from jax.experimental.pallas import tpu as pltpu
import numpy as np


# --------------------------------------------------------------------------
# Kernel 1a: fused GIN aggregation + BN partial statistics (per batch tile).
#   h_k          = scale * x + adj @ x     (scale = 1 + eps [+1 if residual])
#   psum[step]   = sum_{b in tile, f} h_k        per node, shape (1, N, 1)
#   psumsq[step] = sum_{b in tile, f} h_k^2      per node, shape (1, N, 1)
# --------------------------------------------------------------------------
def gin_agg_stats_kernel(scale_ref, adj_ref, x_ref, hk_ref, psum_ref, psq_ref):
    scale = scale_ref[0, 0]                          # SMEM scalar
    a = adj_ref[...]                                 # (B_t, N, N)
    xb = x_ref[...]                                  # (B_t, N, F)
    # Batched matmul on the MXU, f32 accumulation.
    agg = jnp.einsum("bnm,bmf->bnf", a, xb,
                     preferred_element_type=jnp.float32)
    h = scale * xb.astype(jnp.float32) + agg         # (B_t, N, F) f32
    hk_ref[...] = h.astype(hk_ref.dtype)
    # Per-node partial sums for BatchNorm1d(N) training-mode statistics.
    s1 = jnp.sum(h, axis=2, keepdims=True)           # (B_t, N, 1) lane reduce
    s2 = jnp.sum(h * h, axis=2, keepdims=True)       # (B_t, N, 1)
    psum_ref[...] = jnp.sum(s1, axis=0, keepdims=True)   # (1, N, 1)
    psq_ref[...] = jnp.sum(s2, axis=0, keepdims=True)    # (1, N, 1)


# --------------------------------------------------------------------------
# Kernel 1b: aggregation only (use_bn=False path).
# --------------------------------------------------------------------------
def gin_agg_kernel(scale_ref, adj_ref, x_ref, hk_ref):
    scale = scale_ref[0, 0]
    a = adj_ref[...]
    xb = x_ref[...]
    agg = jnp.einsum("bnm,bmf->bnf", a, xb,
                     preferred_element_type=jnp.float32)
    hk_ref[...] = (scale * xb.astype(jnp.float32) + agg).astype(hk_ref.dtype)


# --------------------------------------------------------------------------
# Kernel 2: apply precomputed per-node affine (BN normalize): out = a*h + b.
#   a_ref / b_ref are lane-dense (N, F) operands resident across the grid.
# --------------------------------------------------------------------------
def bn_apply_kernel(h_ref, a_ref, b_ref, out_ref):
    out_ref[...] = a_ref[...][None] * h_ref[...] + b_ref[...][None]


# --------------------------------------------------------------------------
# Helpers
# --------------------------------------------------------------------------
def _pick_batch_tile(B, N, F, in_bytes, budget_bytes=8 * 1024 * 1024):
    """Largest divisor of B whose double-buffered per-step blocks fit `budget`.

    Prefers >= 2 grid steps so the (parallel) batch axis can shard across the
    two TensorCores on v7x; on single-TC chips this is neutral.
    """
    def step_bytes(bt):
        adj_b = bt * N * N * in_bytes
        x_b = bt * N * F * in_bytes
        hk_b = bt * N * F * 4
        return 2 * (adj_b + x_b + hk_b)       # double-buffered pipeline
    divisors = [d for d in range(1, B + 1) if B % d == 0]
    prefer = [d for d in divisors if d <= max(1, B // 2)] or divisors
    best = 1
    for d in prefer:
        if step_bytes(d) <= budget_bytes:
            best = max(best, d)
    # NOTE: for very large N an additional adj-row tiling (t_n, N) would be
    # needed; not required at these shapes.
    return best


# --------------------------------------------------------------------------
# Wrapper
# --------------------------------------------------------------------------
def dense_gin_forward(x, adj, eps, gamma, beta, *, residual=False, use_bn=True,
                      compute_dtype=jnp.float32):
    """x: (B, N, F) f32, adj: (B, N, N) f32, eps scalar, gamma/beta: (N,).

    compute_dtype: dtype used for adj/x inside the matmul kernel.  bfloat16
    halves the HBM-bound adjacency traffic (recommended for throughput on all
    generations; int8 adj is a further option on v5e/v6e only).
    """
    B, N, F = x.shape
    assert adj.shape == (B, N, N)
    out_dtype = jnp.float32

    # (1 + eps) * x + adj @ x  [+ x if residual]  ==  scale * x + adj @ x
    scale_val = 1.0 + jnp.asarray(eps, jnp.float32) + (1.0 if residual else 0.0)
    scale = jnp.reshape(scale_val.astype(jnp.float32), (1, 1))

    adj_c = adj.astype(compute_dtype)
    x_c = x.astype(compute_dtype)
    in_bytes = np.dtype(compute_dtype).itemsize

    B_t = _pick_batch_tile(B, N, F, in_bytes)
    n_steps = B // B_t

    cparams = pltpu.CompilerParams(
        dimension_semantics=("parallel",),
        vmem_limit_bytes=48 * 1024 * 1024,   # <= v7x physical 64 MiB, raises
    )                                        # v5e's 16 MiB default scoped limit

    hk_shape = jax.ShapeDtypeStruct((B, N, F), out_dtype)

    if not use_bn:
        return pl.pallas_call(
            gin_agg_kernel,
            out_shape=hk_shape,
            grid=(n_steps,),
            in_specs=[
                pl.BlockSpec(memory_space=pltpu.MemorySpace.SMEM),      # scale
                pl.BlockSpec((B_t, N, N), lambda b: (b, 0, 0)),         # adj
                pl.BlockSpec((B_t, N, F), lambda b: (b, 0, 0)),         # x
            ],
            out_specs=pl.BlockSpec((B_t, N, F), lambda b: (b, 0, 0)),
            compiler_params=cparams,
        )(scale, adj_c, x_c)

    stat_shape = jax.ShapeDtypeStruct((n_steps, N, 1), jnp.float32)
    h_k, psum, psumsq = pl.pallas_call(
        gin_agg_stats_kernel,
        out_shape=(hk_shape, stat_shape, stat_shape),
        grid=(n_steps,),
        in_specs=[
            pl.BlockSpec(memory_space=pltpu.MemorySpace.SMEM),          # scale
            pl.BlockSpec((B_t, N, N), lambda b: (b, 0, 0)),             # adj
            pl.BlockSpec((B_t, N, F), lambda b: (b, 0, 0)),             # x
        ],
        out_specs=(
            pl.BlockSpec((B_t, N, F), lambda b: (b, 0, 0)),             # h_k
            pl.BlockSpec((1, N, 1), lambda b: (b, 0, 0)),               # psum
            pl.BlockSpec((1, N, 1), lambda b: (b, 0, 0)),               # psumsq
        ),
        compiler_params=cparams,
    )(scale, adj_c, x_c)

    # Tiny (N,) reductions + folding of BN into a per-node affine, in JAX.
    count = jnp.float32(B * F)
    mean = jnp.sum(psum, axis=(0, 2)) / count                 # (N,)
    ex2 = jnp.sum(psumsq, axis=(0, 2)) / count                # (N,)
    var = ex2 - mean * mean                                   # biased (training)
    inv = lax.rsqrt(var + 1e-5)                               # PyTorch BN eps
    a = gamma.astype(jnp.float32) * inv
    b = beta.astype(jnp.float32) - mean * a
    a2 = jnp.broadcast_to(a[:, None], (N, F))                 # lane-dense
    b2 = jnp.broadcast_to(b[:, None], (N, F))

    out = pl.pallas_call(
        bn_apply_kernel,
        out_shape=jax.ShapeDtypeStruct((B, N, F), out_dtype),
        grid=(n_steps,),
        in_specs=[
            pl.BlockSpec((B_t, N, F), lambda i: (i, 0, 0)),   # h_k tile
            pl.BlockSpec((N, F), lambda i: (0, 0)),           # a (resident)
            pl.BlockSpec((N, F), lambda i: (0, 0)),           # b (resident)
        ],
        out_specs=pl.BlockSpec((B_t, N, F), lambda i: (i, 0, 0)),
        compiler_params=cparams,
    )(h_k, a2, b2)
    return out


# --------------------------------------------------------------------------
# Pure-JAX reference for verification
# --------------------------------------------------------------------------
def dense_gin_reference(x, adj, eps, gamma, beta, *, residual=False, use_bn=True):
    h_in = x
    h_k = (1.0 + eps) * h_in + jnp.einsum("bnm,bmf->bnf", adj, x)
    if residual:
        h_k = h_in + h_k
    if use_bn:
        mean = jnp.mean(h_k, axis=(0, 2), keepdims=True)
        var = jnp.mean((h_k - mean) ** 2, axis=(0, 2), keepdims=True)
        h_k = gamma.reshape(1, -1, 1) * (h_k - mean) * lax.rsqrt(var + 1e-5) \
              + beta.reshape(1, -1, 1)
    return h_k


if __name__ == "__main__":
    B, N, F = 8, 16, 32   # batch, nodes, features (infeat == outfeat == 32)

    key = jax.random.PRNGKey(0)
    kx, ka = jax.random.split(key)
    x = jax.random.normal(kx, (B, N, F), dtype=jnp.float32)
    # symmetric dense adjacency with random weights
    a_raw = jax.random.uniform(ka, (B, N, N), dtype=jnp.float32)
    adj = 0.5 * (a_raw + jnp.swapaxes(a_raw, 1, 2))

    eps = jnp.float32(0.05)                        # learnable eps parameter
    gamma = 1.0 + 0.1 * jax.random.normal(jax.random.PRNGKey(1), (N,), jnp.float32)
    beta = 0.1 * jax.random.normal(jax.random.PRNGKey(2), (N,), jnp.float32)
    # self.W (Linear) / dropout / relu are dead code w.r.t. the returned h_k.

    # 1) f32 path, BN on (default configuration)
    out = dense_gin_forward(x, adj, eps, gamma, beta,
                            residual=False, use_bn=True)
    out = jax.block_until_ready(out)
    ref = dense_gin_reference(x, adj, eps, gamma, beta,
                              residual=False, use_bn=True)
    np.testing.assert_allclose(np.asarray(out), np.asarray(ref),
                               rtol=1e-5, atol=1e-5)

    # 2) f32 path, BN off + residual
    out2 = dense_gin_forward(x, adj, eps, gamma, beta,
                             residual=True, use_bn=False)
    out2 = jax.block_until_ready(out2)
    ref2 = dense_gin_reference(x, adj, eps, gamma, beta,
                               residual=True, use_bn=False)
    np.testing.assert_allclose(np.asarray(out2), np.asarray(ref2),
                               rtol=1e-5, atol=1e-5)

    # 3) bf16 adj/x fast path (halved HBM traffic), BN on — loose tolerance
    out3 = dense_gin_forward(x, adj, eps, gamma, beta,
                             residual=False, use_bn=True,
                             compute_dtype=jnp.bfloat16)
    out3 = jax.block_until_ready(out3)
    np.testing.assert_allclose(np.asarray(out3), np.asarray(ref),
                               rtol=5e-2, atol=1e-1)

    print("KERNEL_OK")
</pallas_src>

<mosaic_0001>
module attributes {stable_mosaic.version = 11 : i64} {
  func.func @gin_agg_stats_kernel(%arg0: i32, %arg1: memref<1x1xf32, #tpu.memory_space<smem>>, %arg2: memref<4x16x16xf32, #tpu.memory_space<vmem>>, %arg3: memref<4x16x32xf32, #tpu.memory_space<vmem>>, %arg4: memref<4x16x32xf32, #tpu.memory_space<vmem>>, %arg5: memref<1x16x1xf32, #tpu.memory_space<vmem>>, %arg6: memref<1x16x1xf32, #tpu.memory_space<vmem>>) attributes {dimension_semantics = [#tpu.dimension_semantics<parallel>], iteration_bounds = array<i64: 2>, scalar_prefetch = 0 : i64, scratch_operands = 0 : i64, tpu.core_type = #tpu.core_type<tc>, window_params = [{transform_indices = @transform_0, window_bounds = array<i64: 1, 1>}, {transform_indices = @transform_1, window_bounds = array<i64: 4, 16, 16>}, {transform_indices = @transform_2, window_bounds = array<i64: 4, 16, 32>}, {transform_indices = @transform_3, window_bounds = array<i64: 4, 16, 32>}, {transform_indices = @transform_4, window_bounds = array<i64: 1, 16, 1>}, {transform_indices = @transform_5, window_bounds = array<i64: 1, 16, 1>}]} {
    %c0 = arith.constant 0 : index
    %c0_0 = arith.constant 0 : index
    %0 = memref.load %arg1[%c0, %c0_0] : memref<1x1xf32, #tpu.memory_space<smem>>
    %c0_1 = arith.constant 0 : index
    %c0_2 = arith.constant 0 : index
    %c0_3 = arith.constant 0 : index
    %1 = vector.load %arg2[%c0_1, %c0_2, %c0_3] : memref<4x16x16xf32, #tpu.memory_space<vmem>>, vector<4x16x16xf32>
    %c0_4 = arith.constant 0 : index
    %c0_5 = arith.constant 0 : index
    %c0_6 = arith.constant 0 : index
    %2 = vector.load %arg3[%c0_4, %c0_5, %c0_6] : memref<4x16x32xf32, #tpu.memory_space<vmem>>, vector<4x16x32xf32>
    "tpu.trace_start"() <{level = 10 : i32, message = "bnm,bmf->bnf"}> : () -> ()
    %cst = arith.constant dense<0.000000e+00> : vector<4x16x32xf32>
    %3 = tpu.matmul %1, %2, %cst {dimension_numbers = #tpu.dot_dimension_numbers<[2], [1], [1], [2], [0, 0, 0, 1, 1, 2], [0], [0]>} : vector<4x16x16xf32>, vector<4x16x32xf32>, vector<4x16x32xf32> -> vector<4x16x32xf32>
    "tpu.trace_stop"() : () -> ()
    %4 = vector.broadcast %0 : f32 to vector<4x16x32xf32>
    %5 = arith.mulf %4, %2 : vector<4x16x32xf32>
    %6 = arith.addf %5, %3 : vector<4x16x32xf32>
    %c0_7 = arith.constant 0 : index
    %c0_8 = arith.constant 0 : index
    %c0_9 = arith.constant 0 : index
    %7 = vector.load %arg4[%c0_7, %c0_8, %c0_9] : memref<4x16x32xf32, #tpu.memory_space<vmem>>, vector<4x16x32xf32>
    tpu.vector_store %arg4[%c0_7, %c0_8, %c0_9], %6 {strides = array<i32>} : memref<4x16x32xf32, #tpu.memory_space<vmem>>, vector<4x16x32xf32>,
    %cst_10 = arith.constant dense<0.000000e+00> : vector<4x16xf32>
    %8 = vector.multi_reduction <add>, %6, %cst_10 [2] : vector<4x16x32xf32> to vector<4x16xf32>
    %9 = vector.shape_cast %8 : vector<4x16xf32> to vector<4x16x1xf32>
    %10 = arith.mulf %6, %6 : vector<4x16x32xf32>
    %cst_11 = arith.constant dense<0.000000e+00> : vector<4x16xf32>
    %11 = vector.multi_reduction <add>, %10, %cst_11 [2] : vector<4x16x32xf32> to vector<4x16xf32>
    %12 = vector.shape_cast %11 : vector<4x16xf32> to vector<4x16x1xf32>
    %cst_12 = arith.constant dense<0.000000e+00> : vector<16x1xf32>
    %13 = vector.multi_reduction <add>, %9, %cst_12 [0] : vector<4x16x1xf32> to vector<16x1xf32>
    %14 = vector.shape_cast %13 : vector<16x1xf32> to vector<1x16x1xf32>
    %c0_13 = arith.constant 0 : index
    %c0_14 = arith.constant 0 : index
    %c0_15 = arith.constant 0 : index
    %15 = vector.load %arg5[%c0_13, %c0_14, %c0_15] : memref<1x16x1xf32, #tpu.memory_space<vmem>>, vector<1x16x1xf32>
    tpu.vector_store %arg5[%c0_13, %c0_14, %c0_15], %14 {strides = array<i32>} : memref<1x16x1xf32, #tpu.memory_space<vmem>>, vector<1x16x1xf32>,
    %cst_16 = arith.constant dense<0.000000e+00> : vector<16x1xf32>
    %16 = vector.multi_reduction <add>, %12, %cst_16 [0] : vector<4x16x1xf32> to vector<16x1xf32>
    %17 = vector.shape_cast %16 : vector<16x1xf32> to vector<1x16x1xf32>
    %c0_17 = arith.constant 0 : index
    %c0_18 = arith.constant 0 : index
    %c0_19 = arith.constant 0 : index
    %18 = vector.load %arg6[%c0_17, %c0_18, %c0_19] : memref<1x16x1xf32, #tpu.memory_space<vmem>>, vector<1x16x1xf32>
    tpu.vector_store %arg6[%c0_17, %c0_18, %c0_19], %17 {strides = array<i32>} : memref<1x16x1xf32, #tpu.memory_space<vmem>>, vector<1x16x1xf32>,
    return
  }
  func.func @transform_0(%arg0: i32) -> (i32, i32) {
    %c0_i32 = arith.constant 0 : i32
    %c0_i32_0 = arith.constant 0 : i32
    %c0_i32_1 = arith.constant 0 : i32
    return %c0_i32, %c0_i32_0 : i32, i32
  }
  func.func @transform_1(%arg0: i32) -> (i32, i32, i32) {
    %c0_i32 = arith.constant 0 : i32
    %c0_i32_0 = arith.constant 0 : i32
    %c0_i32_1 = arith.constant 0 : i32
    return %arg0, %c0_i32, %c0_i32_0 : i32, i32, i32
  }
  func.func @transform_2(%arg0: i32) -> (i32, i32, i32) {
    %c0_i32 = arith.constant 0 : i32
    %c0_i32_0 = arith.constant 0 : i32
    %c0_i32_1 = arith.constant 0 : i32
    return %arg0, %c0_i32, %c0_i32_0 : i32, i32, i32
  }
  func.func @transform_3(%arg0: i32) -> (i32, i32, i32) {
    %c0_i32 = arith.constant 0 : i32
    %c0_i32_0 = arith.constant 0 : i32
    %c0_i32_1 = arith.constant 0 : i32
    return %arg0, %c0_i32, %c0_i32_0 : i32, i32, i32
  }
  func.func @transform_4(%arg0: i32) -> (i32, i32, i32) {
    %c0_i32 = arith.constant 0 : i32
    %c0_i32_0 = arith.constant 0 : i32
    %c0_i32_1 = arith.constant 0 : i32
    return %arg0, %c0_i32, %c0_i32_0 : i32, i32, i32
  }
  func.func @transform_5(%arg0: i32) -> (i32, i32, i32) {
    %c0_i32 = arith.constant 0 : i32
    %c0_i32_0 = arith.constant 0 : i32
    %c0_i32_1 = arith.constant 0 : i32
    return %arg0, %c0_i32, %c0_i32_0 : i32, i32, i32
  }
}

</mosaic_0001>

<bundles_post_ra>
// kernel: tpu_custom_call.1
= control target key start
LH: loop header
LB: loop body
LE: loop exit
PB: predicated region body
PF: predicated region fallthrough
CT: control target
= control target key end

     0   :  { %s1241_s0 = inlined_call_operand.<no memory space> [shape: f32[1,1], index: 0, kind: input, shape index: {}]   ;;  %s1242_s1 = inlined_call_operand.hbm [shape: f32[8,16,16], index: 1, kind: input, shape index: {}]   ;;  %s1243_s2 = inlined_call_operand.hbm [shape: f32[8,16,32], index: 2, kind: input, shape index: {}]   ;;  %s1244_s3 = inlined_call_operand.hbm [shape: f32[8,16,32], index: 3, kind: output, shape index: {0}]   ;;  %s1245_s4 = inlined_call_operand.vmem [shape: f32[2,16,1], index: 4, kind: output, shape index: {1}]   ;;  %s1246_s5 = inlined_call_operand.vmem [shape: f32[2,16,1], index: 5, kind: output, shape index: {2}]  }
   0x1   :  { %1247 = sst [smem:[#allocation13_spill]] %s1242_s1 }
   0x2   :  { %11 = sst [smem:[#allocation2]] %s1241_s0 }
   0x3   :  { %12 = vsyncpa [#allocation4], 0 }
   0x4   :  { %14 = vsyncpa [#allocation4 + $0x1], 0 }
   0x5   :  { %15 = vsyncpa [#allocation7], 0 }
   0x6   :  { %17 = vsyncpa [#allocation7 + $0x1], 0 }
   0x7   :  { %18 = vsyncpa [#allocation5], 0 }
   0x8   :  { %20 = vsyncpa [#allocation5 + $0x1], 0  ;;  %s995_s20 = smov 0   ;;  %s997_s21 = smov 0  }
   0x9   :  { %s999_s22 = smov 0   ;;  %s1001_s23 = smov 0  }
   0xa LB: > { %s1016_s0 = sadd.s32 4294967295, %s956_s23   ;;  %s730_s24 = sadd.s32 4294967294, %s956_s23   ;;  %s956_s23 = sphi %s1001_s23, %s1261_s23   ;;  %s952_s22 = sphi %s999_s22, %s1260_s22   ;;  %s948_s21 = sphi %s997_s21, %s1259_s21   ;;  %s944_s20 = sphi %s995_s20, %s1258_s20  }
   0xb   : > { %s1020_s25 = sadd.s32 1, %s956_s23   ;;  %s54_s26 = sadd.s32 1, %s952_s22 }
   0xc   : > { %s51_s27 = ssub.s32 %s956_s23, %s1020_s25  ;;  %p61_p0 = scmp.ne.s32.totalorder %s952_s22, %s948_s21 }
   0xd   : > { %p52_p1 = scmp.eq.s32.totalorder %s51_s27, 0  ;;  %p62_p2 = scmp.eq.s32.totalorder %s956_s23, 0 }
   0xe   : > { %p67_p3 = scmp.ne.s32.totalorder %s948_s21, %s944_s20  ;;  %p68_p4 = scmp.eq.s32.totalorder %s1016_s0, 0 }
   0xf   : > { %s1032_s28 = scalar_select %p52_p1, %s952_s22, %s54_s26  }
  0x10   : > { %p1034_p5 = por %p62_p2, %p61_p0  ;;  %p1038_p6 = por %p68_p4, %p67_p3 }
  0x11   : > { %1248 = sst [smem:[#allocation12_spill]] %s1032_s28  ;;  %p117_p7 = scmp.eq.s32.totalorder %s1016_s0, 1 }
  0x12   : > { %p123_p8 = scmp.eq.s32.totalorder %s730_s24, 1  ;;  %p788_p10 = scmp.lt.s32.totalorder %s956_s23, 2 }
  0x13   : > { %p1045_p11 = por %p117_p7, %p61_p0  ;;  %s1054_s8 = sand.u32 1, %s952_s22  }
  0x14   : > { %p1049_p12 = por %p123_p8, %p67_p3  ;;  %s764_s9 = sshll.u32 %s956_s23, 6 }
  0x15   : > { %s733_s10 = sshll.u32 %s1054_s8, 6  ;;  %s1253_s1 = sld [smem:[#allocation13_spill]] }
  0x16   : > { %s202_s15 = scalar_lea.vmem [#allocation3], %s733_s10  ;;  %p1067_p13 = pnand %p788_p10, %p1034_p5 }
  0x17   : > { %s211_s16 = sshll.u32 %s202_s15, 4  ;;  %p741_p0 = scmp.ge.s32.totalorder %s956_s23, 1  ;;  %s212_s16 = int_to_ptr.vmem [resolvable:$true] %s211_s16 }
  0x18   : > { %p242_p1 = scmp.lt.s32.totalorder %s956_s23, 3  ;;  %s199_s18 = scalar_lea.sflag [#allocation4], %s1054_s8 }
  0x19   : > { %p830_p3 = pneg %p1067_p13 }
  0x1b   : > { %s208_s13 = scalar_lea.hbm %s1253_s1, %s764_s9  ;;  %s833_s29 = scalar_lea.hbm %s1253_s1, 128 }
  0x1c   : > { %s209_s14 = sshll.u32 %s208_s13, 4  ;;  %s210_s14 = int_to_ptr.hbm [resolvable:$true] %s209_s14 }
  0x1d   : > { %s826_s19 = sshra.s32 %s210_s14, 4  ;;  %s827_s19 = int_to_ptr.hbm [resolvable:$true] %s826_s19 }
  0x1e   : > { %s828_s24 = scalar_lea.hbm %s827_s19, 64  ;;  %p834_p5 = scmp.lt.s32.totalorder %s827_s19, %s1253_s1 }
  0x1f   : > { %p829_p2 = scmp.ne.s32.totalorder %s827_s19, %s828_s24  ;;  %p835_p8 = scmp.lt.s32.totalorder %s833_s29, %s828_s24 }
  0x21   : > { %p831_p4 = pnand %p830_p3, %p829_p2  ;;  %p836_p10 = por %p835_p8, %p834_p5 }
  0x23   : > { %p832_p7 = pneg %p831_p4 }
  0x25   : > { %p837_p9 = pnand %p836_p10, %p832_p7 }
  0x27   : > { %840 = shalt.err (!%p837_p9)
}
  0x28   : > { %s958_s13 = smov 128   ;;  %s959_s15 = smov 8  }
  0x29   : > { %780 = dma.hbm_to_vmem [thread:$0]  (!%p1067_p13), %s210_s14, 1024, %s212_s16, %s199_s18, %s958_s13, %s958_s13, %s959_s15  }
  0x2a   : > { %p1091_p2 = pnand %p741_p0, %p242_p1  ;;  %s231_s27 = scalar_lea.hbm %s1243_s2, %s764_s9 }
  0x2b   : > { %s232_s29 = sshll.u32 %s231_s27, 4  ;;  %s225_s11 = scalar_lea.vmem [#allocation6], %s733_s10  ;;  %s233_s29 = int_to_ptr.hbm [resolvable:$true] %s232_s29 }
  0x2c   : > { %s234_s12 = sshll.u32 %s225_s11, 4  ;;  %s222_s1 = scalar_lea.sflag [#allocation7], %s1054_s8  ;;  %s235_s12 = int_to_ptr.vmem [resolvable:$true] %s234_s12 }
  0x2d   : > { %s856_s28 = sshra.s32 %s233_s29, 4  ;;  %s863_s19 = scalar_lea.hbm %s1243_s2, 128  ;;  %s857_s28 = int_to_ptr.hbm [resolvable:$true] %s856_s28 }
  0x2e   : > { %s858_s14 = scalar_lea.hbm %s857_s28, 64  ;;  %p864_p4 = scmp.lt.s32.totalorder %s857_s28, %s1243_s2 }
  0x2f   : > { %p859_p9 = scmp.ne.s32.totalorder %s857_s28, %s858_s14  ;;  %p865_p7 = scmp.lt.s32.totalorder %s863_s19, %s858_s14 }
  0x31   : > { %p861_p0 = pnand %p859_p9, %p830_p3  ;;  %p866_p5 = por %p865_p7, %p864_p4 }
  0x33   : > { %p862_p1 = pneg %p861_p0 }
  0x35   : > { %p867_p8 = pnand %p866_p5, %p862_p1 }
  0x37   : > { %870 = shalt.err (!%p867_p8)
}
  0x38   : > { %783 = dma.hbm_to_vmem [thread:$0]  (!%p1067_p13), %s233_s29, 1024, %s235_s12, %s222_s1, %s958_s13, %s958_s13, %s959_s15  }
  0x39   : > { %246 = sbr.rel (%p1091_p2) target bundleno = 357 (0x165), region = 32  ;;  %s1117_s8 = sand.u32 (!%p1091_p2), 1, %s948_s21  }
  0x3a   : > { %s1120_s10 = sshll.u32 (!%p1091_p2), %s1117_s8, 6  ;;  %s249_s28 = scalar_lea.sflag (!%p1091_p2), [#allocation4], %s1117_s8 }
  0x3b   : > { %s1124_s27 = scalar_lea.vmem (!%p1091_p2), [#allocation3], %s1120_s10 }
  0x3e   : > { %931 = dma.done.wait (%p1038_p6), %s249_s28, 1024  }
  0x3f   : > { %933 = vsyncadd (%p1038_p6), %s249_s28, 4294966272  ;;  %s259_s1 = scalar_lea.sflag [#allocation7], %s1117_s8  ;;  %s262_s17 = scalar_lea.vmem [#allocation6], %s1120_s10 }
  0x40   : > { %935 = dma.done.wait (%p1038_p6), %s259_s1, 1024  }
  0x41   : > { %937 = vsyncadd (%p1038_p6), %s259_s1, 4294966272  ;;  %v328_v0 = vld [vmem:[%s262_s17 + $0x8] sm:$0xff]  ;;  %v330_v1 = vld [vmem:[%s262_s17 + $0x18] sm:$0xff]  ;;  %vm335_vm0 = vcmask 130048   ;;  %s318_s30 = sld [smem:[#allocation2]]  ;;  %vm469_vm1 = vcmask 261120  }
  0x42   : > { %v327_v2 = vld [vmem:[%s262_s17] sm:$0xff]  ;;  %356 = vmatpush.msra.mxu0 %v328_v0  ;;  %385 = vmatpush.msra.mxu1 %v330_v1  ;;  %v329_v3 = vld [vmem:[%s262_s17 + $0x10] sm:$0xff]  ;;  %v1138_v6 = vld [vmem:[%s262_s17 + $0x28] sm:$0xff]  ;;  %s1159_s13 = scalar_lea.vmem [#allocation8], %s1120_s10  ;;  %s770_s15 = sshll.u32 %s1016_s0, 6 }
  0x43   : > { %v319_v4 = vld [vmem:[%s1124_s27] sm:$0xff]  ;;  %v321_v5 = vld [vmem:[%s1124_s27 + $0x10] sm:$0xff]  ;;  %v1140_v7 = vld [vmem:[%s262_s17 + $0x38] sm:$0xff]  ;;  %414 = vmatpush.msra.mxu2 %v1138_v6  ;;  %s574_s11 = scalar_lea.hbm %s1244_s3, %s770_s15  ;;  %s575_s12 = sshll.u32 %s1159_s13, 4  ;;  %s576_s12 = int_to_ptr.vmem [resolvable:$true] %s575_s12 }
  0x44   : > { %357 = vmatpush.msra.mxu0 %v327_v2  ;;  %386 = vmatpush.msra.mxu1 %v329_v3  ;;  %v331_v8 = vld [vmem:[%s262_s17 + $0x20] sm:$0xff]  ;;  %v333_v9 = vld [vmem:[%s262_s17 + $0x30] sm:$0xff]  ;;  %v322_v12 = vld [vmem:[%s1124_s27 + $0x18] sm:$0xff]  ;;  %s577_s14 = sshll.u32 %s574_s11, 4  ;;  %s552_s16 = scalar_lea.sflag [#allocation5], %s1117_s8  ;;  %s578_s14 = int_to_ptr.hbm [resolvable:$true] %s577_s14 }
  0x45   : > { %749 = vmatmul.msk.f32.vlgmr.msra.gmra.mxu0 %vm335_vm0, %v319_v4  ;;  %751 = vmatmul.msk.f32.vlgmr.msra.gmra.mxu1 %vm335_vm0, %v321_v5  ;;  %v323_v10 = vld [vmem:[%s1124_s27 + $0x20] sm:$0xff]  ;;  %v325_v11 = vld [vmem:[%s1124_s27 + $0x30] sm:$0xff]  ;;  %v320_v13 = vld [vmem:[%s1124_s27 + $0x8] sm:$0xff]  ;;  %s900_s18 = sshra.s32 %s578_s14, 4  ;;  %s906_s10 = scalar_lea.hbm %s1244_s3, 128  ;;  %s901_s18 = int_to_ptr.hbm [resolvable:$true] %s900_s18 }
  0x46   : > { %443 = vmatpush.msra.mxu3 %v1140_v7  ;;  %415 = vmatpush.msra.mxu2 %v331_v8  ;;  %v324_v14 = vld [vmem:[%s1124_s27 + $0x28] sm:$0xff]  ;;  %v326_v15 = vld [vmem:[%s1124_s27 + $0x38] sm:$0xff]  ;;  %s902_s19 = scalar_lea.hbm %s901_s18, 64  ;;  %p907_p10 = scmp.lt.s32.totalorder %s901_s18, %s1244_s3 }
  0x47   : > { %753 = vmatmul.msk.f32.vlgmr.msra.gmra.mxu2 %vm335_vm0, %v323_v10  ;;  %v452_v16 = vstv %s318_s30  ;;  %p903_p6 = scmp.ne.s32.totalorder %s901_s18, %s902_s19  ;;  %p908_p2 = scmp.lt.s32.totalorder %s906_s10, %s902_s19 }
  0x48   : > { %444 = vmatpush.msra.mxu3 %v333_v9  ;;  %v453_v17 = vmul.f32 %v452_v16, %v327_v2  ;;  %v455_v18 = vmul.f32 %v452_v16, %v329_v3  ;;  %v456_v26 = vmul.f32 %v452_v16, %v330_v1  ;;  %v454_v29 = vmul.f32 %v452_v16, %v328_v0 }
  0x49   : > { %755 = vmatmul.msk.f32.vlgmr.msra.gmra.mxu3 %vm335_vm0, %v325_v11  ;;  %v457_v30 = vmul.f32 %v452_v16, %v331_v8  ;;  %v459_v31 = vmul.f32 %v452_v16, %v333_v9  ;;  %v458_v44 = vmul.f32 %v452_v16, %v1138_v6  ;;  %v460_v46 = vmul.f32 %v452_v16, %v1140_v7  ;;  %p904_p13 = pnand %p903_p6, %p1045_p11  ;;  %p909_p9 = por %p908_p2, %p907_p10 }
  0x4b   : > { %p905_p3 = pneg %p904_p13 }
  0x4d   : > { %752 = vmatmul.msk.f32.gmra.mxu1 %vm335_vm0, %v322_v12  ;;  %750 = vmatmul.msk.f32.gmra.mxu0 %vm335_vm0, %v320_v13  ;;  %p910_p0 = pnand %p909_p9, %p905_p3 }
  0x4f   : > { %754 = vmatmul.msk.f32.gmra.mxu2 %vm335_vm0, %v324_v14 }
  0x51   : > { %756 = vmatmul.msk.f32.gmra.mxu3 %vm335_vm0, %v326_v15 }
  0xc2   : > { %v359_v19 = vpop.f32.mrf.mxu0  ;;  %v388_v20 = vpop.f32.mrf.mxu1 }
  0xc3   : > { %v461_v21 = vadd.f32 %v453_v17, %v359_v19  ;;  %v463_v22 = vadd.f32 %v455_v18, %v388_v20 }
  0xc5   : > { %470 = vst.msk [vmem:[%s1159_s13] sm:$0xff] %vm469_vm1, %v461_v21  ;;  %v484_v23 = vsel %vm469_vm1, %v463_v22, 0.0  ;;  %v478_v24 = vsel %vm469_vm1, %v461_v21, 0.0  ;;  %v502_v25 = vmul.f32 %v461_v21, %v461_v21  ;;  %v504_v28 = vmul.f32 %v463_v22, %v463_v22 }
  0xc6   : > { %472 = vst.msk [vmem:[%s1159_s13 + $0x10] sm:$0xff] %vm469_vm1, %v463_v22  ;;  %485 = vadd.xlane.f32.xlu1 %v484_v23  ;;  %479 = vadd.xlane.f32.xlu0 %v478_v24 }
  0xc7   : > { %v510_v27 = vsel %vm469_vm1, %v502_v25, 0.0  ;;  %v516_v35 = vsel %vm469_vm1, %v504_v28, 0.0 }
  0xc8   : > { %511 = vadd.xlane.f32.xlu2 %v510_v27 }
  0xca   : > { %v391_v32 = vpop.f32.mrf.mxu1  ;;  %v362_v33 = vpop.f32.mrf.mxu0 }
  0xcb   : > { %v464_v34 = vadd.f32 %v456_v26, %v391_v32  ;;  %v417_v36 = vpop.f32.mrf.mxu2  ;;  %v462_v37 = vadd.f32 %v454_v29, %v362_v33 }
  0xcc   : > { %v446_v38 = vpop.f32.mrf.mxu3  ;;  %v465_v39 = vadd.f32 %v457_v30, %v417_v36 }
  0xcd   : > { %473 = vst.msk [vmem:[%s1159_s13 + $0x18] sm:$0xff] %vm469_vm1, %v464_v34  ;;  %v487_v40 = vsel %vm469_vm1, %v464_v34, 0.0  ;;  %v467_v41 = vadd.f32 %v459_v31, %v446_v38  ;;  %v503_v45 = vmul.f32 %v462_v37, %v462_v37  ;;  %v505_v54 = vmul.f32 %v464_v34, %v464_v34 }
  0xce   : > { %488 = vadd.xlane.f32.xlu1 %v487_v40  ;;  %517 = vadd.xlane.f32.xlu0 %v516_v35  ;;  %471 = vst.msk [vmem:[%s1159_s13 + $0x8] sm:$0xff] %vm469_vm1, %v462_v37  ;;  %v490_v42 = vsel %vm469_vm1, %v465_v39, 0.0  ;;  %v506_v43 = vmul.f32 %v465_v39, %v465_v39  ;;  %v481_v57 = vsel %vm469_vm1, %v462_v37, 0.0 }
  0xcf   : > { %474 = vst.msk [vmem:[%s1159_s13 + $0x20] sm:$0xff] %vm469_vm1, %v465_v39  ;;  %v496_v48 = vsel %vm469_vm1, %v467_v41, 0.0  ;;  %v513_v51 = vsel %vm469_vm1, %v503_v45, 0.0  ;;  %v519_v56 = vsel %vm469_vm1, %v505_v54, 0.0  ;;  %v508_v60 = vmul.f32 %v467_v41, %v467_v41 }
  0xd0   : > { %491 = vadd.xlane.f32.xlu2 %v490_v42  ;;  %476 = vst.msk [vmem:[%s1159_s13 + $0x30] sm:$0xff] %vm469_vm1, %v467_v41  ;;  %v522_v47 = vsel %vm469_vm1, %v506_v43, 0.0 }
  0xd1   : > { %v528_v62 = vsel %vm469_vm1, %v508_v60, 0.0 }
  0xd3   : > { %v420_v49 = vpop.f32.mrf.mxu2 }
  0xd4   : > { %v449_v50 = vpop.f32.mrf.mxu3  ;;  %v466_v52 = vadd.f32 %v458_v44, %v420_v49 }
  0xd5   : > { %v468_v53 = vadd.f32 %v460_v46, %v449_v50 }
  0xd6   : > { %523 = vadd.xlane.f32.xlu1 %v522_v47  ;;  %497 = vadd.xlane.f32.xlu0 %v496_v48  ;;  %475 = vst.msk [vmem:[%s1159_s13 + $0x28] sm:$0xff] %vm469_vm1, %v466_v52  ;;  %v507_v55 = vmul.f32 %v466_v52, %v466_v52  ;;  %v493_v61 = vsel %vm469_vm1, %v466_v52, 0.0 }
  0xd7   : > { %477 = vst.msk [vmem:[%s1159_s13 + $0x38] sm:$0xff] %vm469_vm1, %v468_v53  ;;  %v499_v59 = vsel %vm469_vm1, %v468_v53, 0.0  ;;  %v509_v63 = vmul.f32 %v468_v53, %v468_v53 }
  0xd8   : > { %514 = vadd.xlane.f32.xlu2 %v513_v51  ;;  %v525_v58 = vsel %vm469_vm1, %v507_v55, 0.0 }
  0xde   : > { %520 = vadd.xlane.f32.xlu1 %v519_v56  ;;  %482 = vadd.xlane.f32.xlu0 %v481_v57 }
  0xe0   : > { %526 = vadd.xlane.f32.xlu2 %v525_v58 }
  0xe6   : > { %494 = vadd.xlane.f32.xlu0 %v493_v61  ;;  %500 = vadd.xlane.f32.xlu1 %v499_v59 }
  0xe7   : > { %913 = shalt.err (!%p910_p0)
}
  0xe8   : > { %s960_s8 = smov 128   ;;  %s961_s1 = smov 8   ;;  %529 = vadd.xlane.f32.xlu2 %v528_v62  ;;  %v531_v0 = vsel %vm469_vm1, %v509_v63, 0.0  ;;  %vm540_vm2 = vcmask 7168  }
  0xe9   : > { %775 = dma.vmem_to_hbm [thread:$0]  (%p1045_p11), %s576_s12, 1024, %s578_s14, %s552_s16, %s960_s8, %s960_s8, %s961_s1  }
  0xea   : > { %p308_p1 = scmp.lt.s32.totalorder %s1016_s0, 1 }
  0xec   : > { %s1263_s0 = smov (!%p308_p1, %s1016_s0), 1 }
  0xed   : > { %s767_s17 = sshll.u32 %s1263_s0, 4 }
  0xee   : > { %532 = vadd.xlane.f32.xlu0 %v531_v0  ;;  %s312_s6 = scalar_lea.vmem %s1245_s4, %s767_s17  ;;  %s317_s26 = scalar_lea.vmem %s1246_s5, %s767_s17 }
 0x139   : > { %v486_v1 = vpop.xlane.xlu1 %485  ;;  %v480_v2 = vpop.xlane.xlu0 %479 }
 0x13a   : > { %v534_v7 = vadd.f32 %v486_v1, %v480_v2 }
 0x13b   : > { %v512_v3 = vpop.xlane.xlu2 %511 }
 0x141   : > { %v489_v4 = vpop.xlane.xlu1 %488  ;;  %v518_v5 = vpop.xlane.xlu0 %517 }
 0x142   : > { %v543_v16 = vadd.f32 %v518_v5, %v512_v3 }
 0x143   : > { %v492_v6 = vpop.xlane.xlu2 %491 }
 0x144   : > { %v535_v8 = vadd.f32 %v534_v7, %v492_v6 }
 0x149   : > { %v524_v9 = vpop.xlane.xlu1 %523  ;;  %v498_v10 = vpop.xlane.xlu0 %497 }
 0x14a   : > { %v536_v11 = vadd.f32 %v535_v8, %v498_v10  ;;  %v544_v20 = vadd.f32 %v543_v16, %v524_v9 }
 0x14b   : > { %v515_v12 = vpop.xlane.xlu2 %514 }
 0x14c   : > { %541 = vst.msk [vmem:[%s312_s6] sm:$0xff] %vm540_vm2, %v536_v11 }
 0x151   : > { %v521_v13 = vpop.xlane.xlu1 %520  ;;  %v483_v14 = vpop.xlane.xlu0 %482 }
 0x152   : > { %v537_v17 = vadd.f32 %v489_v4, %v483_v14  ;;  %v546_v23 = vadd.f32 %v521_v13, %v515_v12 }
 0x153   : > { %v527_v15 = vpop.xlane.xlu2 %526 }
 0x154   : > { %v547_v26 = vadd.f32 %v546_v23, %v527_v15 }
 0x159   : > { %v495_v18 = vpop.xlane.xlu0 %494  ;;  %v501_v19 = vpop.xlane.xlu1 %500 }
 0x15a   : > { %v538_v21 = vadd.f32 %v537_v17, %v495_v18 }
 0x15b   : > { %v530_v22 = vpop.xlane.xlu2 %529 }
 0x15c   : > { %v539_v24 = vadd.f32 %v538_v21, %v501_v19  ;;  %v545_v25 = vadd.f32 %v544_v20, %v530_v22 }
 0x15e   : > { %542 = vst.msk [vmem:[%s312_s6 + $0x8] sm:$0xff] %vm540_vm2, %v539_v24 }
 0x15f   : > { %549 = vst.msk [vmem:[%s317_s26] sm:$0xff] %vm540_vm2, %v545_v25 }
 0x161   : > { %v533_v27 = vpop.xlane.xlu0 %532 }
 0x162   : > { %v548_v28 = vadd.f32 %v547_v26, %v533_v27 }
 0x164   : > { %550 = vst.msk [vmem:[%s317_s26 + $0x8] sm:$0xff] %vm540_vm2, %v548_v28 }
 0x165 PF: > { %s598_s29 = sand.u32 1, %s944_s20   ;;  %p1256_p11 = scmp.ge.s32.totalorder %s956_s23, 2 }
 0x166   : > { %s599_s11 = scalar_lea.sflag [#allocation5], %s598_s29 }
 0x167   : > { %p785_p4 = pnand %p1256_p11, %p1049_p12 }
 0x169   : > { %p786_p7 = pneg %p785_p4 }
 0x16b   : > { %939 = dma.done.wait (%p786_p7), %s599_s11, 1024  }
 0x16c   : > { %941 = vsyncadd (%p786_p7), %s599_s11, 4294966272  ;;  %s1257_s12 = sld [smem:[#allocation12_spill]]  ;;  %p23_p5 = scmp.ge.s32.totalorder %s1020_s25, 4  }
 0x16d   : > { %s1258_s20 = smov %s948_s21  ;;  %s1259_s21 = smov %s952_s22 }
 0x16e   : > { %s1261_s23 = smov %s1020_s25  ;;  %25 = sbr.rel (!%p23_p5) target bundleno = 10 (0xa), region = 114 }
 0x172   : > { %s1260_s22 = smov %s1257_s12 }
 0x173   :  { %621 = vsyncpa [#allocation4], 1 }
 0x174   :  { %623 = vsyncpa [#allocation4 + $0x1], 1 }
 0x175   :  { %624 = vsyncpa [#allocation7], 1 }
 0x176   :  { %626 = vsyncpa [#allocation7 + $0x1], 1 }
 0x177   :  { %627 = vsyncpa [#allocation5], 1 }
 0x178   :  { %629 = vsyncpa [#allocation5 + $0x1], 1 }

</bundles_post_ra>
